<compile_context>
chip_gen: v7x
topology: tpu7x:2x2x1
jax: 0.10.0
libtpu: 0.0.40
codegen_flags: <defaults>
</compile_context>

<pallas_src>
import functools

import jax
import jax.numpy as jnp
from jax import lax
from jax.experimental import pallas as pl
from jax.experimental.pallas import tpu as pltpu

_SUBLANES = 8
_EPS = 1e-6

_VMEM_FLOOR = 8 << 20          # never request less than this
_MIN_FUSED_BLOCK = 512 << 10   # don't shrink below this when splitting for megacore
_CHUNK_ROWS = 512              # L-chunk (rows) for in-kernel f32 temporaries


def _tpu_info():
    """(vmem_capacity_bytes, num_tensorcores) with conservative fallbacks."""
    cap = 64 << 20
    cores = 1
    try:
        info = pltpu.get_tpu_info()
        cap = int(getattr(info, "vmem_capacity_bytes", cap))
        for name in ("num_cores", "core_count", "num_tensorcores", "tensorcore_count"):
            v = getattr(info, name, None)
            if v:
                cores = int(v)
                break
    except Exception:
        pass
    return cap, cores


def _refined_reciprocal(d):
    # EUP approximate reciprocal (free VLIW slot) + one Newton step -> ~f32 exact.
    r = pl.reciprocal(d, approx=True)
    return r * (2.0 - d * r)


def _single_pass_vmem(tb, l, c, itemsize, chunk):
    block = tb * l * c
    ch = tb * min(chunk, l) * c
    # x + out blocks double-buffered (native dtype), ~3 chunk-sized f32 temps,
    # f32 gamma/beta double-buffered, fixed slack.
    return 4 * block * itemsize + 3 * ch * 4 + 4 * c * 4 + (2 << 20)


def _pick_tb(b, l, c, itemsize, chunk, budget, num_cores):
    """Largest divisor of B whose fused block fits the VMEM budget."""
    best = 1
    for tb in range(1, b + 1):
        if b % tb == 0 and _single_pass_vmem(tb, l, c, itemsize, chunk) <= budget:
            best = tb
    # Only split for megacore if the chip actually has >1 TensorCore; on v5e/v6e
    # (1 TC) extra grid steps are pure per-step overhead.
    if num_cores >= 2 and best == b and b > 1:
        for tb in range(max(1, b // num_cores), 0, -1):
            if b % tb == 0 and tb * l * c * itemsize >= _MIN_FUSED_BLOCK:
                return tb
    return best


# ----------------------------------------------------------------------------
# Single-pass kernel: whole (TB, L, C) slab resident in VMEM (native dtype);
# compute is chunked over L so only chunk-sized f32 temporaries are live.
# ----------------------------------------------------------------------------
def _grn_fused_kernel(x_ref, gamma_ref, beta_ref, o_ref, *, chunk):
    tb, l, c = x_ref.shape
    inv_c = 1.0 / float(c)
    n_full = l // chunk
    rem = l - n_full * chunk

    def ssq_of(start, size):
        xc = x_ref[:, pl.ds(start, size), :].astype(jnp.float32)
        return jnp.sum(xc * xc, axis=1, keepdims=True)           # (tb, 1, c)

    # ---- pass 1: sum of squares over tokens, chunked over L ---------------
    if n_full >= 2:
        def body(i, acc):
            return acc + ssq_of(pl.multiple_of(i * chunk, chunk), chunk)
        ssq = lax.fori_loop(0, n_full, body, jnp.zeros((tb, 1, c), jnp.float32))
    elif n_full == 1:
        ssq = ssq_of(0, chunk)
    else:
        ssq = jnp.zeros((tb, 1, c), jnp.float32)
    if rem:
        ssq = ssq + ssq_of(n_full * chunk, rem)

    gx = jnp.sqrt(ssq)                                           # (tb, 1, c)
    denom = jnp.sum(gx, axis=-1, keepdims=True) * inv_c + _EPS   # (tb, 1, 1)
    nx = gx * _refined_reciprocal(denom)                         # (tb, 1, c)
    gamma = gamma_ref[...].astype(jnp.float32)[None]             # (1, 1, c)
    beta = beta_ref[...].astype(jnp.float32)[None]               # (1, 1, c)
    scale = gamma * nx + 1.0                                     # (tb, 1, c)

    # ---- pass 2: y = x * scale + beta (one mul + one add per element) -----
    def apply_at(start, size):
        xc = x_ref[:, pl.ds(start, size), :].astype(jnp.float32)
        o_ref[:, pl.ds(start, size), :] = (xc * scale + beta).astype(o_ref.dtype)

    if n_full >= 2:
        def body2(i, carry):
            apply_at(pl.multiple_of(i * chunk, chunk), chunk)
            return carry
        lax.fori_loop(0, n_full, body2, 0)
    elif n_full == 1:
        apply_at(0, chunk)
    if rem:
        apply_at(n_full * chunk, rem)


def _grn_single_pass(x, gamma2d, beta2d, *, budget, num_cores, chunk_rows):
    b, l, c = x.shape
    itemsize = jnp.dtype(x.dtype).itemsize
    chunk = int(min(l, chunk_rows))
    if chunk < l:
        chunk = max(_SUBLANES, (chunk // _SUBLANES) * _SUBLANES)
    tb = _pick_tb(b, l, c, itemsize, chunk, budget, num_cores)
    est = _single_pass_vmem(tb, l, c, itemsize, chunk)
    vmem_limit = int(min(budget, max(_VMEM_FLOOR, est)))
    return pl.pallas_call(
        functools.partial(_grn_fused_kernel, chunk=chunk),
        out_shape=jax.ShapeDtypeStruct((b, l, c), x.dtype),
        grid_spec=pltpu.PrefetchScalarGridSpec(
            num_scalar_prefetch=0,
            grid=(b // tb,),
            in_specs=[
                pl.BlockSpec((tb, l, c), lambda i: (i, 0, 0)),
                pl.BlockSpec((1, c), lambda i: (0, 0)),
                pl.BlockSpec((1, c), lambda i: (0, 0)),
            ],
            out_specs=pl.BlockSpec((tb, l, c), lambda i: (i, 0, 0)),
        ),
        compiler_params=pltpu.CompilerParams(
            dimension_semantics=("parallel",),
            vmem_limit_bytes=vmem_limit,
        ),
        cost_estimate=pl.CostEstimate(
            flops=int(4 * b * l * c),
            transcendentals=int(b * c + b),
            bytes_accessed=int(2 * b * l * c * itemsize + 2 * c * 4),
        ),
    )(x, gamma2d, beta2d)


# ----------------------------------------------------------------------------
# Two-pass fallback: tiled-L stats kernel + elementwise apply kernel.
# Used when a full (L, C) slab cannot be VMEM-resident, or for B==1 on a
# multi-TensorCore chip (so both cores get work along the L grid axis).
# ----------------------------------------------------------------------------
def _grn_stats_kernel(x_ref, nx_ref, *, l, mask_last):
    _, tile_l, c = x_ref.shape
    li = pl.program_id(1)

    @pl.when(li == 0)
    def _init():
        nx_ref[...] = jnp.zeros_like(nx_ref)

    x = x_ref[...].astype(jnp.float32)                           # (1, tile_l, c)
    if mask_last:
        # Last tile is partial: mask rows >= L so garbage rows contribute 0.
        rows = lax.broadcasted_iota(jnp.int32, x.shape, 1)
        x = jnp.where(rows < (l - li * tile_l), x, 0.0)
    nx_ref[...] += jnp.sum(x * x, axis=1, keepdims=True)         # f32 sum of squares

    @pl.when(li == pl.num_programs(1) - 1)
    def _finalize():
        gx = jnp.sqrt(nx_ref[...])                               # (1, 1, c)
        denom = jnp.sum(gx, axis=-1, keepdims=True) * (1.0 / float(c)) + _EPS
        nx_ref[...] = gx * _refined_reciprocal(denom)


def _grn_apply_kernel(x_ref, nx_ref, gamma_ref, beta_ref, o_ref):
    x = x_ref[...].astype(jnp.float32)                           # (1, tile_l, c)
    gamma = gamma_ref[...].astype(jnp.float32)[None]             # (1, 1, c)
    beta = beta_ref[...].astype(jnp.float32)[None]               # (1, 1, c)
    scale = gamma * nx_ref[...] + 1.0                            # (1, 1, c)
    # Out-of-bounds rows of a partial last tile are discarded by Pallas.
    o_ref[...] = (x * scale + beta).astype(o_ref.dtype)


def _grn_two_pass(x, gamma2d, beta2d, *, budget, cap, tile_l=None):
    b, l, c = x.shape
    itemsize = jnp.dtype(x.dtype).itemsize
    apply_target = (8 << 20) if cap >= (96 << 20) else (5 << 20)
    bytes_per_row = c * (4 * itemsize + 8) + 1   # apply-pass live bytes per L row
    max_rows_budget = max(_SUBLANES, (budget - (4 << 20)) // bytes_per_row)
    if tile_l is None:
        tile_l = max(_SUBLANES, apply_target // (c * itemsize))
    tile_l = int(min(l, int(tile_l), max_rows_budget))
    if tile_l < l:
        tile_l = max(_SUBLANES, (tile_l // _SUBLANES) * _SUBLANES)
        tile_l = min(tile_l, l)
    n_l = -(-l // tile_l)
    mask_last = (l % tile_l) != 0
    blk = tile_l * c

    # Pass 1: Nx stats (f32), accumulated in the resident (1, 1, C) output block.
    stats_vmem = int(min(budget, max(
        _VMEM_FLOOR, 2 * blk * itemsize + 3 * blk * 4 + 8 * c * 4 + (2 << 20))))
    nx = pl.pallas_call(
        functools.partial(_grn_stats_kernel, l=l, mask_last=mask_last),
        out_shape=jax.ShapeDtypeStruct((b, 1, c), jnp.float32),
        grid_spec=pltpu.PrefetchScalarGridSpec(
            num_scalar_prefetch=0,
            grid=(b, n_l),
            in_specs=[pl.BlockSpec((1, tile_l, c), lambda i, j: (i, j, 0))],
            out_specs=pl.BlockSpec((1, 1, c), lambda i, j: (i, 0, 0)),
        ),
        compiler_params=pltpu.CompilerParams(
            dimension_semantics=("parallel", "arbitrary"),
            vmem_limit_bytes=stats_vmem,
        ),
        cost_estimate=pl.CostEstimate(
            flops=int(2 * b * l * c),
            transcendentals=int(b * c),
            bytes_accessed=int(b * l * c * itemsize + b * c * 4),
        ),
    )(x)

    # Pass 2: elementwise apply, tiled freely over L (both grid axes parallel).
    apply_vmem = int(min(budget, max(
        _VMEM_FLOOR, 4 * blk * itemsize + 2 * blk * 4 + 16 * c * 4 + (2 << 20))))
    out = pl.pallas_call(
        _grn_apply_kernel,
        out_shape=jax.ShapeDtypeStruct((b, l, c), x.dtype),
        grid_spec=pltpu.PrefetchScalarGridSpec(
            num_scalar_prefetch=0,
            grid=(b, n_l),
            in_specs=[
                pl.BlockSpec((1, tile_l, c), lambda i, j: (i, j, 0)),
                pl.BlockSpec((1, 1, c), lambda i, j: (i, 0, 0)),
                pl.BlockSpec((1, c), lambda i, j: (0, 0)),
                pl.BlockSpec((1, c), lambda i, j: (0, 0)),
            ],
            out_specs=pl.BlockSpec((1, tile_l, c), lambda i, j: (i, j, 0)),
        ),
        compiler_params=pltpu.CompilerParams(
            dimension_semantics=("parallel", "parallel"),
            vmem_limit_bytes=apply_vmem,
        ),
        cost_estimate=pl.CostEstimate(
            flops=int(2 * b * l * c),
            transcendentals=0,
            bytes_accessed=int(2 * b * l * c * itemsize + b * c * 4 + 2 * c * 4),
        ),
    )(x, nx, gamma2d, beta2d)
    return out


# ----------------------------------------------------------------------------
# Public wrapper
# ----------------------------------------------------------------------------
def grn(x, gamma, beta, *, force_two_pass=False, tile_l=None, chunk_rows=_CHUNK_ROWS):
    """GRN forward. x: (B, L, C); gamma, beta: any shape reshapeable to (1, 1, C)."""
    b, l, c = x.shape
    itemsize = jnp.dtype(x.dtype).itemsize
    # gamma/beta stay float32 (tiny 1xC vectors): no precision loss, no extra casts.
    gamma2d = jnp.reshape(gamma, (1, c)).astype(jnp.float32)
    beta2d = jnp.reshape(beta, (1, c)).astype(jnp.float32)

    cap, num_cores = _tpu_info()
    headroom = min(24 << 20, max(8 << 20, cap // 6))
    budget = max(24 << 20, min(cap - headroom, 112 << 20))

    chunk = int(min(l, chunk_rows))
    if chunk < l:
        chunk = max(_SUBLANES, (chunk // _SUBLANES) * _SUBLANES)
    fits_single = _single_pass_vmem(1, l, c, itemsize, chunk) <= budget
    # B == 1 on a multi-TC chip would leave all but one core idle in the
    # single-pass (1-step grid); a tiled-L two-pass keeps every core busy.
    small_batch_multicore = (
        num_cores >= 2 and b < num_cores and l * c * itemsize >= (16 << 20))

    if force_two_pass or not fits_single or small_batch_multicore:
        return _grn_two_pass(x, gamma2d, beta2d, budget=budget, cap=cap, tile_l=tile_l)
    return _grn_single_pass(x, gamma2d, beta2d, budget=budget,
                            num_cores=num_cores, chunk_rows=chunk_rows)


def grn_ref(x, gamma, beta):
    """Pure-JAX reference matching the PyTorch forward."""
    gamma = gamma.reshape(1, 1, -1)
    beta = beta.reshape(1, 1, -1)
    gx = jnp.sqrt(jnp.sum(x * x, axis=1, keepdims=True))        # (B, 1, C)
    nx = gx / (jnp.mean(gx, axis=-1, keepdims=True) + _EPS)     # (B, 1, C)
    return gamma * (x * nx) + beta + x


if __name__ == "__main__":
    key = jax.random.PRNGKey(0)
    kx, kg, kb = jax.random.split(key, 3)

    # Small shape consistent with the module: (batch=2, tokens=8, channels=32).
    B, L, C = 2, 8, 32
    x = jax.random.normal(kx, (B, L, C), dtype=jnp.float32)
    # Module __init__ zero-inits gamma/beta; use small random values so the
    # normalization path is actually exercised.
    gamma = 0.1 * jax.random.normal(kg, (1, 1, C), dtype=jnp.float32)
    beta = 0.1 * jax.random.normal(kb, (1, 1, C), dtype=jnp.float32)

    out = jax.block_until_ready(grn(x, gamma, beta))
    ref = grn_ref(x, gamma, beta)
    assert out.shape == ref.shape
    assert jnp.allclose(out, ref, atol=1e-4, rtol=1e-4), "single-pass mismatch"

    # Two-pass path with a PARTIAL last L tile (exercises the iota mask).
    B2, L2, C2 = 2, 60, 32
    x2 = jax.random.normal(kx, (B2, L2, C2), dtype=jnp.float32)
    g2 = 0.1 * jax.random.normal(kg, (1, 1, C2), dtype=jnp.float32)
    b2 = 0.1 * jax.random.normal(kb, (1, 1, C2), dtype=jnp.float32)
    out2 = jax.block_until_ready(grn(x2, g2, b2, force_two_pass=True, tile_l=16))
    ref2 = grn_ref(x2, g2, b2)
    assert out2.shape == ref2.shape
    assert jnp.allclose(out2, ref2, atol=1e-4, rtol=1e-4), "two-pass mismatch"

    # Single-pass with in-kernel L chunking + remainder (fori_loop path).
    B3, L3, C3 = 2, 20, 32
    x3 = jax.random.normal(kx, (B3, L3, C3), dtype=jnp.float32)
    g3 = 0.1 * jax.random.normal(kg, (1, 1, C3), dtype=jnp.float32)
    b3 = 0.1 * jax.random.normal(kb, (1, 1, C3), dtype=jnp.float32)
    out3 = jax.block_until_ready(grn(x3, g3, b3, chunk_rows=8))
    ref3 = grn_ref(x3, g3, b3)
    assert out3.shape == ref3.shape
    assert jnp.allclose(out3, ref3, atol=1e-4, rtol=1e-4), "chunked single-pass mismatch"

    print("KERNEL_OK")
</pallas_src>

<mosaic_0001>
module attributes {stable_mosaic.version = 11 : i64} {
  func.func @_grn_fused_kernel(%arg0: i32, %arg1: memref<2x8x32xf32, #tpu.memory_space<vmem>>, %arg2: memref<1x32xf32, #tpu.memory_space<vmem>>, %arg3: memref<1x32xf32, #tpu.memory_space<vmem>>, %arg4: memref<2x8x32xf32, #tpu.memory_space<vmem>>) attributes {dimension_semantics = [#tpu.dimension_semantics<parallel>], iteration_bounds = array<i64: 1>, scalar_prefetch = 0 : i64, scratch_operands = 0 : i64, tpu.core_type = #tpu.core_type<tc>, window_params = [{transform_indices = @transform_0, window_bounds = array<i64: 2, 8, 32>}, {pipeline_mode = #tpu.pipeline_mode<synchronous>, transform_indices = @transform_1, window_bounds = array<i64: 1, 32>}, {pipeline_mode = #tpu.pipeline_mode<synchronous>, transform_indices = @transform_2, window_bounds = array<i64: 1, 32>}, {transform_indices = @transform_3, window_bounds = array<i64: 2, 8, 32>}]} {
    %c0 = arith.constant 0 : index
    %c0_0 = arith.constant 0 : index
    %c0_1 = arith.constant 0 : index
    %0 = vector.load %arg1[%c0, %c0_0, %c0_1] : memref<2x8x32xf32, #tpu.memory_space<vmem>>, vector<2x8x32xf32>
    %1 = arith.mulf %0, %0 : vector<2x8x32xf32>
    %cst = arith.constant dense<0.000000e+00> : vector<2x32xf32>
    %2 = vector.multi_reduction <add>, %1, %cst [1] : vector<2x8x32xf32> to vector<2x32xf32>
    %3 = vector.shape_cast %2 : vector<2x32xf32> to vector<2x1x32xf32>
    %4 = math.sqrt %3 : vector<2x1x32xf32>
    %cst_2 = arith.constant dense<0.000000e+00> : vector<2x1xf32>
    %5 = vector.multi_reduction <add>, %4, %cst_2 [2] : vector<2x1x32xf32> to vector<2x1xf32>
    %6 = vector.shape_cast %5 : vector<2x1xf32> to vector<2x1x1xf32>
    %cst_3 = arith.constant 3.125000e-02 : f32
    %7 = vector.broadcast %cst_3 : f32 to vector<2x1x1xf32>
    %8 = arith.mulf %6, %7 : vector<2x1x1xf32>
    %cst_4 = arith.constant 9.99999997E-7 : f32
    %9 = vector.broadcast %cst_4 : f32 to vector<2x1x1xf32>
    %10 = arith.addf %8, %9 : vector<2x1x1xf32>
    %11 = tpu.reciprocal %10 {approx = true} : vector<2x1x1xf32> -> vector<2x1x1xf32>
    %12 = arith.mulf %10, %11 : vector<2x1x1xf32>
    %cst_5 = arith.constant 2.000000e+00 : f32
    %13 = vector.broadcast %cst_5 : f32 to vector<2x1x1xf32>
    %14 = arith.subf %13, %12 : vector<2x1x1xf32>
    %15 = arith.mulf %11, %14 : vector<2x1x1xf32>
    %16 = vector.broadcast %15 : vector<2x1x1xf32> to vector<2x1x32xf32>
    %17 = arith.mulf %4, %16 : vector<2x1x32xf32>
    %c0_6 = arith.constant 0 : index
    %c0_7 = arith.constant 0 : index
    %18 = vector.load %arg2[%c0_6, %c0_7] : memref<1x32xf32, #tpu.memory_space<vmem>>, vector<1x32xf32>
    %19 = vector.shape_cast %18 : vector<1x32xf32> to vector<1x1x32xf32>
    %c0_8 = arith.constant 0 : index
    %c0_9 = arith.constant 0 : index
    %20 = vector.load %arg3[%c0_8, %c0_9] : memref<1x32xf32, #tpu.memory_space<vmem>>, vector<1x32xf32>
    %21 = vector.shape_cast %20 : vector<1x32xf32> to vector<1x1x32xf32>
    %22 = vector.broadcast %19 : vector<1x1x32xf32> to vector<2x1x32xf32>
    %23 = arith.mulf %22, %17 : vector<2x1x32xf32>
    %cst_10 = arith.constant 1.000000e+00 : f32
    %24 = vector.broadcast %cst_10 : f32 to vector<2x1x32xf32>
    %25 = arith.addf %23, %24 : vector<2x1x32xf32>
    %c0_11 = arith.constant 0 : index
    %c0_12 = arith.constant 0 : index
    %c0_13 = arith.constant 0 : index
    %26 = vector.load %arg1[%c0_11, %c0_12, %c0_13] : memref<2x8x32xf32, #tpu.memory_space<vmem>>, vector<2x8x32xf32>
    %27 = vector.broadcast %25 : vector<2x1x32xf32> to vector<2x8x32xf32>
    %28 = arith.mulf %26, %27 : vector<2x8x32xf32>
    %29 = vector.broadcast %21 : vector<1x1x32xf32> to vector<2x8x32xf32>
    %30 = arith.addf %28, %29 : vector<2x8x32xf32>
    %c0_14 = arith.constant 0 : index
    %c0_15 = arith.constant 0 : index
    %c0_16 = arith.constant 0 : index
    %31 = vector.load %arg4[%c0_14, %c0_15, %c0_16] : memref<2x8x32xf32, #tpu.memory_space<vmem>>, vector<2x8x32xf32>
    tpu.vector_store %arg4[%c0_14, %c0_15, %c0_16], %30 {strides = array<i32>} : memref<2x8x32xf32, #tpu.memory_space<vmem>>, vector<2x8x32xf32>,
    return
  }
  func.func @transform_0(%arg0: i32) -> (i32, i32, i32) {
    %c0_i32 = arith.constant 0 : i32
    %c0_i32_0 = arith.constant 0 : i32
    %c0_i32_1 = arith.constant 0 : i32
    return %arg0, %c0_i32, %c0_i32_0 : i32, i32, i32
  }
  func.func @transform_1(%arg0: i32) -> (i32, i32) {
    %c0_i32 = arith.constant 0 : i32
    %c0_i32_0 = arith.constant 0 : i32
    %c0_i32_1 = arith.constant 0 : i32
    return %c0_i32, %c0_i32_0 : i32, i32
  }
  func.func @transform_2(%arg0: i32) -> (i32, i32) {
    %c0_i32 = arith.constant 0 : i32
    %c0_i32_0 = arith.constant 0 : i32
    %c0_i32_1 = arith.constant 0 : i32
    return %c0_i32, %c0_i32_0 : i32, i32
  }
  func.func @transform_3(%arg0: i32) -> (i32, i32, i32) {
    %c0_i32 = arith.constant 0 : i32
    %c0_i32_0 = arith.constant 0 : i32
    %c0_i32_1 = arith.constant 0 : i32
    return %arg0, %c0_i32, %c0_i32_0 : i32, i32, i32
  }
}

</mosaic_0001>

<bundles_post_ra>
// kernel: tpu_custom_call.1
= control target key start
LH: loop header
LB: loop body
LE: loop exit
PB: predicated region body
PF: predicated region fallthrough
CT: control target
= control target key end

     0   :  { %8 = vsyncpa [#allocation3], 0  ;;  %s266_s0 = inlined_call_operand.hbm [shape: f32[2,8,32], index: 0, kind: input, shape index: {}]   ;;  %s267_s1 = inlined_call_operand.vmem [shape: f32[1,32], index: 1, kind: input, shape index: {}]   ;;  %s268_s2 = inlined_call_operand.vmem [shape: f32[1,32], index: 2, kind: input, shape index: {}]   ;;  %s269_s3 = inlined_call_operand.hbm [shape: f32[2,8,32], index: 3, kind: output, shape index: {}]  }
   0x1   :  { %9 = vsyncpa [#allocation4], 0  ;;  %s190_s12 = smov [#allocation2]   ;;  %s142_s16 = scalar_lea.hbm %s266_s0, 256 }
   0x2   :  { %s15_s13 = sshll.u32 %s190_s12, 4  ;;  %p143_p0 = scmp.ne.s32.totalorder %s266_s0, %s142_s16  ;;  %s16_s13 = int_to_ptr.vmem [resolvable:$true] %s15_s13 }
   0x3   :  { %p146_p1 = scmp.lt.u32.totalorder %s142_s16, %s266_s0 }
   0x5   :  { %p148_p2 = pnand %p146_p1, %p143_p0 }
   0x7   :  { %151 = shalt.err (!%p148_p2)
}
   0x8   :  { %s152_s21 = scalar_lea.vmem %s16_s13, 256  ;;  %p157_p4 = scmp.lt.s32.totalorder %s16_s13, %s16_s13 }
   0x9   :  { %p153_p3 = scmp.ne.s32.totalorder %s16_s13, %s152_s21  ;;  %p158_p5 = scmp.lt.s32.totalorder %s152_s21, %s152_s21 }
   0xb   :  { %p159_p6 = por %p158_p5, %p157_p4 }
   0xd   :  { %p160_p7 = pnand %p159_p6, %p153_p3 }
   0xf   :  { %163 = shalt.err (!%p160_p7)
}
  0x10   :  { %s191_s22 = smov 128   ;;  %s192_s23 = smov 8  }
  0x11   :  { %21 = dma.hbm_to_vmem [thread:$0]  %s266_s0, 256, %s16_s13, [#allocation3], %s191_s22, %s191_s22, %s192_s23  }
  0x12   :  { %186 = dma.done.wait [#allocation3], 256  }
  0x13   :  { %187 = vsyncadd [#allocation3], 4294967040  ;;  %v229_v0 = vld [vmem:[#allocation2] sm:$0xff]  ;;  %v231_v1 = vld [vmem:[#allocation2 + $0x8] sm:$0xff]  ;;  %vm33_vm0 = vcmask 261120   ;;  %v90_v38 = vlaneseq  ;;  %s193_s29 = smov [#allocation5]  }
  0x14   :  { %v31_v2 = vmul.f32 %v229_v0, %v229_v0  ;;  %v32_v3 = vmul.f32 %v231_v1, %v231_v1  ;;  %v82_v44 = vld [vmem:[%s267_s1] sm:$0x1]  ;;  %s117_s1 = sshll.u32 %s193_s29, 4  ;;  %s118_s1 = int_to_ptr.vmem [resolvable:$true] %s117_s1 }
  0x15   :  { %v91_v42 = vshrl.u32 %v90_v38, 7  ;;  %v129_v54 = vld [vmem:[%s268_s2] ss:$0 sm:$0xff]  ;;  %s164_s30 = scalar_lea.vmem %s118_s1, 256  ;;  %p169_p9 = scmp.lt.s32.totalorder %s118_s1, %s118_s1 }
  0x16   :  { %v34_v4 = vsel %vm33_vm0, %v31_v2, 0.0  ;;  %v41_v5 = vsel %vm33_vm0, %v32_v3, 0.0  ;;  %p165_p8 = scmp.ne.s32.totalorder %s118_s1, %s164_s30  ;;  %p170_p10 = scmp.lt.s32.totalorder %s164_s30, %s164_s30 }
  0x17   :  { %v35_v6 = vrot.slane %v34_v4, 4  ;;  %v42_v7 = vrot.slane %v41_v5, 4  ;;  %v92_v48 = vsub.s32 0, %v91_v42 }
  0x18   :  { %p171_p11 = por %p170_p10, %p169_p9 }
  0x19   :  { %v36_v8 = vadd.f32 %v35_v6, %v34_v4  ;;  %v43_v9 = vadd.f32 %v42_v7, %v41_v5 }
  0x1a   :  { %p172_p12 = pnand %p171_p11, %p165_p8 }
  0x1b   :  { %v37_v10 = vrot.slane %v36_v8, 2  ;;  %v44_v11 = vrot.slane %v43_v9, 2 }
  0x1d   :  { %v38_v12 = vadd.f32 %v37_v10, %v36_v8  ;;  %v45_v13 = vadd.f32 %v44_v11, %v43_v9 }
  0x1f   :  { %v39_v14 = vrot.slane %v38_v12, 1  ;;  %v46_v15 = vrot.slane %v45_v13, 1 }
  0x21   :  { %v40_v16 = vadd.f32 %v39_v14, %v38_v12  ;;  %v47_v17 = vadd.f32 %v46_v15, %v45_v13 }
  0x23   :  { %134 = vrsqrt.f32 %v40_v16  ;;  %vm50_vm1 = vcmp.eq.f32.partialorder %v40_v16, inf  ;;  %v53_v19 = vand.u32 2147483648, %v40_v16  ;;  %vm52_vm2 = vcmp.eq.f32.partialorder %v40_v16, 0.0 }
  0x24   :  { %136 = vrsqrt.f32 %v47_v17  ;;  %vm57_vm3 = vcmp.eq.f32.partialorder %v47_v17, inf  ;;  %v60_v22 = vand.u32 2147483648, %v47_v17  ;;  %vm59_vm4 = vcmp.eq.f32.partialorder %v47_v17, 0.0 }
  0x2d   :  { %v135_v18 = vpop.eup %134 }
  0x2e   :  { %v137_v20 = vpop.eup %136  ;;  %v49_v21 = vmul.f32 %v135_v18, %v40_v16 }
  0x2f   :  { %v56_v23 = vmul.f32 %v137_v20, %v47_v17 }
  0x30   :  { %v51_v24 = vsel %vm50_vm1, %v40_v16, %v49_v21 }
  0x31   :  { %v54_v25 = vsel %vm52_vm2, %v53_v19, %v51_v24  ;;  %v58_v26 = vsel %vm57_vm3, %v47_v17, %v56_v23 }
  0x32   :  { %v62_v27 = vsel %vm33_vm0, %v54_v25, 0.0  ;;  %v61_v28 = vsel %vm59_vm4, %v60_v22, %v58_v26 }
  0x33   :  { %63 = vadd.xlane.f32.xlu0 %v62_v27  ;;  %v65_v29 = vsel %vm33_vm0, %v61_v28, 0.0 }
  0x37   :  { %66 = vadd.xlane.f32.xlu0 %v65_v29 }
  0xc0   :  { %v64_v30 = vpop.xlane.xlu0 %63 }
  0xc1   :  { %v68_v31 = vmul.f32 0.03125, %v64_v30 }
  0xc3   :  { %v70_v32 = vadd.f32 1e-06, %v68_v31 }
  0xc4   :  { %v67_v33 = vpop.xlane.xlu0 %66 }
  0xc5   :  { %138 = vrcp.f32 %v70_v32  ;;  %v69_v34 = vmul.f32 0.03125, %v67_v33 }
  0xc7   :  { %v71_v35 = vadd.f32 1e-06, %v69_v34 }
  0xc9   :  { %140 = vrcp.f32 %v71_v35 }
  0xcf   :  { %v139_v36 = vpop.eup %138 }
  0xd0   :  { %v74_v37 = vmul.f32 %v139_v36, %v70_v32 }
  0xd2   :  { %v76_v39 = vsub.f32 2.0, %v74_v37 }
  0xd3   :  { %v141_v40 = vpop.eup %140 }
  0xd4   :  { %v78_v41 = vmul.f32 %v139_v36, %v76_v39  ;;  %v75_v43 = vmul.f32 %v141_v40, %v71_v35 }
  0xd6   :  { %v80_v45 = vmul.f32 %v78_v41, %v54_v25  ;;  %v77_v46 = vsub.f32 2.0, %v75_v43 }
  0xd8   :  { %v84_v47 = vmul.f32 %v82_v44, %v80_v45  ;;  %v79_v49 = vmul.f32 %v141_v40, %v77_v46 }
  0xda   :  { %v86_v50 = vadd.f32 1.0, %v84_v47  ;;  %v81_v51 = vmul.f32 %v79_v49, %v61_v28 }
  0xdc   :  { %v85_v52 = vmul.f32 %v82_v44, %v81_v51  ;;  %v93_v53 = vrot.slane %v86_v50, %v92_v48 }
  0xde   :  { %v87_v55 = vadd.f32 1.0, %v85_v52  ;;  %v100_v56 = vmul.f32 %v93_v53, %v229_v0 }
  0xe0   :  { %v97_v57 = vrot.slane %v87_v55, %v92_v48  ;;  %v108_v58 = vadd.f32 %v129_v54, %v100_v56 }
  0xe2   :  { %v101_v59 = vmul.f32 %v97_v57, %v231_v1  ;;  %110 = vst.msk [vmem:[#allocation5] sm:$0xff] %vm33_vm0, %v108_v58 }
  0xe4   :  { %v109_v60 = vadd.f32 %v129_v54, %v101_v59 }
  0xe6   :  { %111 = vst.msk [vmem:[#allocation5 + $0x8] sm:$0xff] %vm33_vm0, %v109_v60 }
  0xe7   :  { %175 = shalt.err (!%p172_p12)
}
  0xe8   :  { %s176_s5 = scalar_lea.hbm %s269_s3, 256 }
  0xe9   :  { %p177_p13 = scmp.ne.s32.totalorder %s269_s3, %s176_s5  ;;  %p180_p0 = scmp.lt.u32.totalorder %s176_s5, %s269_s3 }
  0xeb   :  { %p182_p1 = pnand %p180_p0, %p177_p13 }
  0xed   :  { %185 = shalt.err (!%p182_p1)
}
  0xee   :  { %123 = dma.vmem_to_hbm [thread:$0]  %s118_s1, 256, %s269_s3, [#allocation4], %s191_s22, %s191_s22, %s192_s23  }
  0xef   :  { %188 = dma.done.wait [#allocation4], 256  }
  0xf0   :  { %189 = vsyncadd [#allocation4], 4294967040 }
  0xf1   :  { %127 = vsyncpa [#allocation3], 1 }
  0xf2   :  { %128 = vsyncpa [#allocation4], 1 }

</bundles_post_ra>
